<compile_context>
chip_gen: v6e
topology: v6e:2x2x1
jax: 0.10.0
libtpu: 0.0.40
codegen_flags: <defaults>
</compile_context>

<pallas_src>
import jax
import jax.numpy as jnp
from jax.experimental import pallas as pl
from jax.experimental.pallas import tpu as pltpu

SUBLANE = 8    # f32 sublane tile
LANE = 128     # lane tile


def _make_relu_linear_kernel(batch: int, d_in: int):
    """Kernel for out[b, :] = relu(x[b, :]) @ W^T + b, fully unrolled.

    x_smem : (batch, d_in) f32 in SMEM (scalars)
    w_ref  : (SUBLANE, LANE) f32 in VMEM; rows [0, d_in) = W^T (padded),
             row d_in = bias (padded), remaining rows = zero padding.
    o_ref  : (SUBLANE, LANE) f32 in VMEM; only [:batch, :d_out] is meaningful.
    """

    def kernel(x_smem, w_ref, o_ref):
        w = w_ref[...]                               # one vreg-sized tile
        bias = w[d_in:d_in + 1, :]                   # (1, LANE)

        rows = []
        for b in range(batch):                       # static unroll (batch=2)
            acc = bias
            for k in range(d_in):                    # static unroll (d_in=2)
                xk = jnp.maximum(x_smem[b, k], 0.0)  # ReLU on a scalar (SMEM)
                acc = acc + xk * w[k:k + 1, :]       # scalar splat * row FMA
            rows.append(acc)

        n_pad = o_ref.shape[0] - batch
        if n_pad:
            rows.append(jnp.zeros((n_pad, o_ref.shape[1]), dtype=o_ref.dtype))
        # One lane-dense, unmasked full-tile store.
        o_ref[...] = jnp.concatenate(rows, axis=0)

    return kernel


def relu_linear_bias(x, w, b):
    """relu(x) @ w.T + b via a single-tile Pallas kernel.

    x: (B, D_in) f32, w: (D_out, D_in) f32, b: (D_out,) f32. Returns (B, D_out).
    """
    B, D_in = x.shape
    D_out, D_in_w = w.shape
    assert D_in_w == D_in and b.shape == (D_out,)
    assert x.dtype == jnp.float32
    # Single-tile fast path only; a larger problem should use a gridded,
    # MXU-backed kernel (or plain XLA) instead.
    assert B <= SUBLANE and (D_in + 1) <= SUBLANE and D_out <= LANE

    # Fold bias into the transposed weight and pad to one (8, 128) tile.
    w_aug = jnp.zeros((SUBLANE, LANE), dtype=x.dtype)
    w_aug = w_aug.at[:D_in, :D_out].set(jnp.transpose(w))
    w_aug = w_aug.at[D_in, :D_out].set(b)

    out_padded = pl.pallas_call(
        _make_relu_linear_kernel(B, D_in),
        out_shape=jax.ShapeDtypeStruct((SUBLANE, LANE), x.dtype),
        in_specs=[
            pl.BlockSpec(memory_space=pltpu.MemorySpace.SMEM),   # x scalars
            pl.BlockSpec(memory_space=pltpu.MemorySpace.VMEM),   # [W^T ; b] tile
        ],
        out_specs=pl.BlockSpec(memory_space=pltpu.MemorySpace.VMEM),
    )(x, w_aug)

    # Slice out the meaningful (B, D_out) slab on the XLA side.
    return out_padded[:B, :D_out]


def model_forward(x, w, b):
    y = relu_linear_bias(x, w, b)            # (2, 4)
    return jnp.reshape(y, (2, 1, 4, 1))      # matches torch.reshape(x, [2,1,4,1])


if __name__ == "__main__":
    key = jax.random.PRNGKey(0)
    kx, kw, kb = jax.random.split(key, 3)

    # Input x: (2, 2), same as torch.randn(2, 2).
    x = jax.random.normal(kx, (2, 2), dtype=jnp.float32)

    # nn.Linear(2, 4): weight (4, 2), bias (4,). Deterministic init here.
    w = jax.random.normal(kw, (4, 2), dtype=jnp.float32) * 0.5
    b = jax.random.normal(kb, (4,), dtype=jnp.float32) * 0.1

    out = model_forward(x, w, b)
    jax.block_until_ready(out)

    # Sanity check against the plain-JAX (XLA-fused) reference.
    ref = jnp.reshape(
        jnp.maximum(x, 0.0) @ jnp.transpose(w) + b.reshape(1, 4), (2, 1, 4, 1)
    )
    assert out.shape == (2, 1, 4, 1), out.shape
    assert jnp.allclose(out, ref, atol=1e-5, rtol=1e-5)

    print("KERNEL_OK")
</pallas_src>

<mosaic_0001>
module attributes {stable_mosaic.version = 11 : i64} {
  func.func @kernel(%arg0: memref<2x2xf32, #tpu.memory_space<smem>>, %arg1: memref<8x128xf32, #tpu.memory_space<vmem>>, %arg2: memref<8x128xf32, #tpu.memory_space<vmem>>) attributes {dimension_semantics = [], scalar_prefetch = 0 : i64, scratch_operands = 0 : i64, tpu.core_type = #tpu.core_type<tc>} {
    %c0 = arith.constant 0 : index
    %c0_0 = arith.constant 0 : index
    %0 = vector.load %arg1[%c0, %c0_0] : memref<8x128xf32, #tpu.memory_space<vmem>>, vector<8x128xf32>
    %1 = vector.extract_strided_slice %0 {offsets = [2, 0], sizes = [1, 128], strides = [1, 1]} : vector<8x128xf32> to vector<1x128xf32>
    %c0_1 = arith.constant 0 : index
    %c0_2 = arith.constant 0 : index
    %2 = memref.load %arg0[%c0_1, %c0_2] : memref<2x2xf32, #tpu.memory_space<smem>>
    %cst = arith.constant 0.000000e+00 : f32
    %3 = arith.maximumf %2, %cst : f32
    %4 = vector.extract_strided_slice %0 {offsets = [0, 0], sizes = [1, 128], strides = [1, 1]} : vector<8x128xf32> to vector<1x128xf32>
    %5 = vector.broadcast %3 : f32 to vector<1x128xf32>
    %6 = arith.mulf %5, %4 : vector<1x128xf32>
    %7 = arith.addf %1, %6 : vector<1x128xf32>
    %c0_3 = arith.constant 0 : index
    %c1 = arith.constant 1 : index
    %8 = memref.load %arg0[%c0_3, %c1] : memref<2x2xf32, #tpu.memory_space<smem>>
    %cst_4 = arith.constant 0.000000e+00 : f32
    %9 = arith.maximumf %8, %cst_4 : f32
    %10 = vector.extract_strided_slice %0 {offsets = [1, 0], sizes = [1, 128], strides = [1, 1]} : vector<8x128xf32> to vector<1x128xf32>
    %11 = vector.broadcast %9 : f32 to vector<1x128xf32>
    %12 = arith.mulf %11, %10 : vector<1x128xf32>
    %13 = arith.addf %7, %12 : vector<1x128xf32>
    %c1_5 = arith.constant 1 : index
    %c0_6 = arith.constant 0 : index
    %14 = memref.load %arg0[%c1_5, %c0_6] : memref<2x2xf32, #tpu.memory_space<smem>>
    %cst_7 = arith.constant 0.000000e+00 : f32
    %15 = arith.maximumf %14, %cst_7 : f32
    %16 = vector.extract_strided_slice %0 {offsets = [0, 0], sizes = [1, 128], strides = [1, 1]} : vector<8x128xf32> to vector<1x128xf32>
    %17 = vector.broadcast %15 : f32 to vector<1x128xf32>
    %18 = arith.mulf %17, %16 : vector<1x128xf32>
    %19 = arith.addf %1, %18 : vector<1x128xf32>
    %c1_8 = arith.constant 1 : index
    %c1_9 = arith.constant 1 : index
    %20 = memref.load %arg0[%c1_8, %c1_9] : memref<2x2xf32, #tpu.memory_space<smem>>
    %cst_10 = arith.constant 0.000000e+00 : f32
    %21 = arith.maximumf %20, %cst_10 : f32
    %22 = vector.extract_strided_slice %0 {offsets = [1, 0], sizes = [1, 128], strides = [1, 1]} : vector<8x128xf32> to vector<1x128xf32>
    %23 = vector.broadcast %21 : f32 to vector<1x128xf32>
    %24 = arith.mulf %23, %22 : vector<1x128xf32>
    %25 = arith.addf %19, %24 : vector<1x128xf32>
    %cst_11 = arith.constant 0.000000e+00 : f32
    %26 = vector.broadcast %cst_11 : f32 to vector<6x128xf32>
    %27 = tpu.concatenate %13, %25, %26 in 0 : vector<1x128xf32>, vector<1x128xf32>, vector<6x128xf32> -> vector<8x128xf32>
    %c0_12 = arith.constant 0 : index
    %c0_13 = arith.constant 0 : index
    %28 = vector.load %arg2[%c0_12, %c0_13] : memref<8x128xf32, #tpu.memory_space<vmem>>, vector<8x128xf32>
    tpu.vector_store %arg2[%c0_12, %c0_13], %27 {strides = array<i32>} : memref<8x128xf32, #tpu.memory_space<vmem>>, vector<8x128xf32>,
    return
  }
}

</mosaic_0001>

<bundles_post_ra>
// kernel: tpu_custom_call.1
= control target key start
LH: loop header
LB: loop body
LE: loop exit
PB: predicated region body
PF: predicated region fallthrough
CT: control target
= control target key end

     0   :  { %7 = vsyncpa [#allocation5], 0  ;;  %s184_s0 = inlined_call_operand.hbm [shape: f32[2,2], index: 0, kind: input, shape index: {}]   ;;  %s185_s1 = inlined_call_operand.hbm [shape: f32[8,128], index: 1, kind: input, shape index: {}]   ;;  %s186_s2 = inlined_call_operand.hbm [shape: f32[8,128], index: 2, kind: output, shape index: {}]  }
   0x1   :  { %8 = vsyncpa [#allocation3], 0 }
   0x2   :  { %9 = vsyncpa [#allocation4], 0  ;;  %s156_s9 = smov [#allocation2]   ;;  %s157_s12 = smov [#allocation6]  }
   0x3   :  { %17 = dma.hbm_to_smem %s184_s0, 32, %s156_s9, [#allocation5]  }
   0x4   :  { %s24_s13 = sshll.u32 %s157_s12, 4  ;;  %s25_s13 = int_to_ptr.vmem [resolvable:$true] %s24_s13 }
   0x5   :  { %s118_s14 = scalar_lea.vmem %s25_s13, 128  ;;  %p123_p1 = scmp.lt.s32.totalorder %s25_s13, %s25_s13 }
   0x6   :  { %p119_p0 = scmp.ne.s32.totalorder %s25_s13, %s118_s14  ;;  %p124_p2 = scmp.lt.s32.totalorder %s118_s14, %s118_s14 }
   0x8   :  { %p125_p3 = por %p124_p2, %p123_p1 }
   0xa   :  { %p126_p4 = pnand %p125_p3, %p119_p0 }
   0xc   :  { %129 = shalt.err (!%p126_p4)
}
   0xd   :  { %27 = dma.hbm_to_vmem [thread:$0]  %s185_s1, 128, %s25_s13, [#allocation3]  }
   0xe   :  { %150 = dma.done.wait [#allocation5], 32  }
   0xf   :  { %151 = vsyncadd [#allocation5], 4294967264 }
  0x10   :  { %152 = dma.done.wait [#allocation3], 128  }
  0x11   :  { %153 = vsyncadd [#allocation3], 4294967168 }
  0x12   :  { %34 = sfence }
  0x13   :  { %s36_s0 = sld [smem:[#allocation2]]  ;;  %v35_v0 = vld [vmem:[#allocation6] sm:$0xff]  ;;  %s158_s20 = smov 0.0   ;;  %vm74_vm0 = vcmask 1040384   ;;  %vm76_vm1 = vcmask 1041408  }
  0x14   :  { %s95_s17 = sld [smem:[#allocation2 + $0x1]]  ;;  %s159_s24 = smov [#allocation7]  }
  0x15   :  { %s96_s18 = sld [smem:[#allocation2 + $0x80]]  ;;  %s85_s25 = sshll.u32 %s159_s24, 4  ;;  %s86_s25 = int_to_ptr.vmem [resolvable:$true] %s85_s25 }
  0x16   :  { %s97_s19 = sld [smem:[#allocation2 + $0x81]]  ;;  %s130_s26 = scalar_lea.vmem %s86_s25, 128 }
  0x17   :  { %p131_p5 = scmp.ne.s32.totalorder %s86_s25, %s130_s26  ;;  %p135_p6 = scmp.lt.s32.totalorder %s86_s25, %s86_s25 }
  0x18   :  { %p136_p7 = scmp.lt.s32.totalorder %s130_s26, %s130_s26 }
  0x19   :  { %s37_s21 = smax.f32 %s158_s20, %s36_s0 }
  0x1a   :  { %v38_v1 = vstv %s37_s21  ;;  %s45_s22 = smax.f32 %s158_s20, %s95_s17  ;;  %p137_p8 = por %p136_p7, %p135_p6 }
  0x1b   :  { %v39_v2 = vmul.f32 %v38_v1, %v35_v0  ;;  %v46_v3 = vstv %s45_s22  ;;  %s53_s23 = smax.f32 %s158_s20, %s96_s18 }
  0x1c   :  { %v47_v4 = vmul.f32 %v46_v3, %v35_v0  ;;  %v54_v5 = vstv %s53_s23  ;;  %s61_s1 = smax.f32 %s158_s20, %s97_s19  ;;  %p138_p9 = pnand %p137_p8, %p131_p5 }
  0x1d   :  { %v41_v6 = vrot.slane %v39_v2, 6  ;;  %v55_v7 = vmul.f32 %v54_v5, %v35_v0  ;;  %v62_v8 = vstv %s61_s1 }
  0x1e   :  { %v49_v9 = vrot.slane %v47_v4, 7  ;;  %v63_v10 = vmul.f32 %v62_v8, %v35_v0 }
  0x1f   :  { %v43_v11 = vadd.f32 %v41_v6, %v35_v0  ;;  %v57_v12 = vrot.slane %v55_v7, 6 }
  0x20   :  { %v65_v13 = vrot.slane %v63_v10, 7 }
  0x21   :  { %v51_v14 = vadd.f32 %v49_v9, %v43_v11  ;;  %v59_v15 = vadd.f32 %v57_v12, %v35_v0 }
  0x23   :  { %v67_v16 = vadd.f32 %v65_v13, %v59_v15  ;;  %v69_v17 = vrot.slane %v51_v14, 2 }
  0x25   :  { %v72_v18 = vrot.slane %v67_v16, 1 }
  0x27   :  { %v75_v19 = vsel %vm74_vm0, %v69_v17, %v72_v18 }
  0x28   :  { %v77_v20 = vsel %vm76_vm1, %v75_v19, 0.0 }
  0x29   :  { %78 = vst [vmem:[#allocation7] sm:$0xff] %v77_v20 }
  0x2a   :  { %141 = shalt.err (!%p138_p9)
}
  0x2b   :  { %88 = dma.vmem_to_hbm [thread:$0]  %s86_s25, 128, %s186_s2, [#allocation4]  }
  0x2c   :  { %154 = dma.done.wait [#allocation4], 128  }
  0x2d   :  { %155 = vsyncadd [#allocation4], 4294967168 }
  0x2e   :  { %92 = vsyncpa [#allocation3], 1 }
  0x2f   :  { %93 = vsyncpa [#allocation4], 1 }
  0x30   :  { %94 = vsyncpa [#allocation5], 1 }

</bundles_post_ra>
